<compile_context>
chip_gen: v7x
topology: tpu7x:2x2x1
jax: 0.10.0
libtpu: 0.0.40
codegen_flags: <defaults>
</compile_context>

<pallas_src>
import functools

import jax
import jax.numpy as jnp
from jax.experimental import pallas as pl
from jax.experimental.pallas import tpu as pltpu

EPS = 1e-5  # nn.LayerNorm default


def residual_kernel(x_ref, w_ref, b_ref, gamma_ref, beta_ref, o_ref, *,
                    d_valid, matmul_dtype):
    # x_ref: (TM, Dp) tile of input rows (native dtype), Dp lane-dense (mult of 128)
    # w_ref: (Dp, Dp)  sublayer weight, stored (in, out); zero-padded beyond d_valid
    # b_ref, gamma_ref, beta_ref: (1, Dp), zero-padded beyond d_valid
    x = x_ref[...]

    # --- sublayer: Linear(dim, dim) on the MXU; f32 accumulation ---
    if matmul_dtype is None:
        xm, wm = x, w_ref[...]
    else:
        xm, wm = x.astype(matmul_dtype), w_ref[...].astype(matmul_dtype)
    y = jnp.dot(xm, wm, preferred_element_type=jnp.float32)
    y = y + b_ref[...].astype(jnp.float32)

    # --- dropout (eval mode -> identity) + residual add (f32) ---
    # TODO(synk): training-mode dropout would need pltpu.prng_seed/prng_random_bits
    z = x.astype(jnp.float32) + y

    # --- LayerNorm over the true feature dim (stats in f32) ---
    d_pad = z.shape[-1]
    inv_d = 1.0 / float(d_valid)
    if d_valid != d_pad:
        # Padded columns are zero on input; keep them zero through the stats.
        col = jax.lax.broadcasted_iota(jnp.int32, z.shape, 1)
        valid = col < d_valid
        z = jnp.where(valid, z, 0.0)
        mean = jnp.sum(z, axis=-1, keepdims=True) * inv_d
        centered = jnp.where(valid, z - mean, 0.0)
    else:
        mean = jnp.sum(z, axis=-1, keepdims=True) * inv_d
        centered = z - mean
    var = jnp.sum(centered * centered, axis=-1, keepdims=True) * inv_d
    z_hat = centered * jax.lax.rsqrt(var + EPS)
    out = z_hat * gamma_ref[...].astype(jnp.float32) + beta_ref[...].astype(jnp.float32)

    o_ref[...] = out.astype(o_ref.dtype)


def _round_up(x, m):
    return (x + m - 1) // m * m


def _vmem_budgets():
    """(vmem_limit_bytes for the compiler, byte budget for tile sizing)."""
    cap = None
    try:
        info = pltpu.get_tpu_info()
        cap = int(getattr(info, "vmem_capacity_bytes", 0)) or None
    except Exception:
        cap = None
    if cap is None:
        cap = 64 << 20  # conservative: v7x physical VMEM per TensorCore
    # ~64 MiB scoped on 128-MiB chips (v5e/v6e), ~32 MiB on v7x (64 MiB phys).
    scoped_limit = min(64 << 20, cap // 2)
    tile_budget = max(scoped_limit - (8 << 20), 8 << 20)  # leave compiler headroom
    return scoped_limit, tile_budget


def _pick_tile_rows(rows, d_pad, itemsize, requested, tile_budget):
    """Row tile: biggest (multiple of 8) that fits the budget, >=2 grid steps."""
    if rows <= 8:
        return rows  # single block equal to the full (short) row extent

    # Per-row VMEM cost: double-buffered input + output tiles in native dtype
    # (2 + 2) plus ~3 f32 intermediates (y, z, centered) staged through VMEM.
    per_row = d_pad * (4 * itemsize + 3 * 4)
    # Fixed cost: single-buffered (Dp,Dp) weight + bias/gamma/beta + slack.
    fixed = d_pad * d_pad * itemsize + 3 * d_pad * itemsize + (64 << 10)
    avail = max(tile_budget - fixed, 8 * per_row)
    tr_max = max(8, (avail // per_row) // 8 * 8)

    if requested is None:
        # Target ~2 MiB of input rows per tile so per-grid-step overhead is
        # amortized (small-D configs get tiles in the thousands of rows).
        requested = max(256, (2 << 20) // (d_pad * itemsize))

    tr = max(8, (min(requested, tr_max) // 8) * 8)
    tr = min(tr, (rows // 8) * 8)               # never bigger than the row count
    # Keep at least 2 grid steps so the "parallel" axis can shard across the
    # two v7x TensorCores (one extra ~0.35us step is noise on 1-TC chips).
    tr = min(tr, _round_up(-(-rows // 2), 8))
    return max(8, tr)


def residual_forward(x, w, b, gamma, beta, *, tile_rows=None, matmul_dtype=None):
    """x: (B, S, D).  Returns LayerNorm(x + Linear(x))  (eval-mode dropout).

    matmul_dtype: optionally feed the MXU narrower operands (e.g. jnp.bfloat16
    on v5e with f32 weights); residual add + LayerNorm stats stay in f32.
    """
    B, S, D = x.shape
    rows = B * S
    dt = x.dtype
    itemsize = jnp.dtype(dt).itemsize

    # Lane-dense feature dim: pad once in the wrapper if D % 128 != 0.
    D_pad = D if D % 128 == 0 else _round_up(D, 128)

    x2d = x.reshape(rows, D)
    if D_pad != D:
        pad_d = D_pad - D
        x2d = jnp.pad(x2d, ((0, 0), (0, pad_d)))
        w_p = jnp.pad(w, ((0, pad_d), (0, pad_d)))
        b_p = jnp.pad(b, (0, pad_d))
        g_p = jnp.pad(gamma, (0, pad_d))
        be_p = jnp.pad(beta, (0, pad_d))
    else:
        w_p, b_p, g_p, be_p = w, b, gamma, beta

    scoped_limit, tile_budget = _vmem_budgets()
    tr = _pick_tile_rows(rows, D_pad, itemsize, tile_rows, tile_budget)
    n_tiles = pl.cdiv(rows, tr)  # edge block (if any) is masked by Pallas

    # Grid-invariant operands: constant index_map + single buffer (no point
    # double-buffering blocks that never change).
    single = pl.Buffered(buffer_count=1)

    kernel = functools.partial(residual_kernel, d_valid=D, matmul_dtype=matmul_dtype)

    out2d = pl.pallas_call(
        kernel,
        out_shape=jax.ShapeDtypeStruct((rows, D_pad), dt),
        grid=(n_tiles,),
        in_specs=[
            pl.BlockSpec((tr, D_pad), lambda i: (i, 0)),                           # x rows
            pl.BlockSpec((D_pad, D_pad), lambda i: (0, 0), pipeline_mode=single),  # weight
            pl.BlockSpec((1, D_pad), lambda i: (0, 0), pipeline_mode=single),      # bias
            pl.BlockSpec((1, D_pad), lambda i: (0, 0), pipeline_mode=single),      # ln gamma
            pl.BlockSpec((1, D_pad), lambda i: (0, 0), pipeline_mode=single),      # ln beta
        ],
        out_specs=pl.BlockSpec((tr, D_pad), lambda i: (i, 0)),
        compiler_params=pltpu.CompilerParams(
            dimension_semantics=("parallel",),
            vmem_limit_bytes=int(scoped_limit)),
    )(x2d, w_p, b_p.reshape(1, D_pad), g_p.reshape(1, D_pad), be_p.reshape(1, D_pad))

    if D_pad != D:
        out2d = out2d[:, :D]
    return out2d.reshape(B, S, D)


def reference(x, w, b, gamma, beta):
    y = jnp.einsum("bsd,de->bse", x.astype(jnp.float32), w.astype(jnp.float32)) + b
    z = x.astype(jnp.float32) + y
    mean = jnp.mean(z, axis=-1, keepdims=True)
    var = jnp.mean((z - mean) ** 2, axis=-1, keepdims=True)
    return ((z - mean) / jnp.sqrt(var + EPS) * gamma + beta).astype(x.dtype)


if __name__ == "__main__":
    key = jax.random.PRNGKey(0)
    kx, kw, kb, kx2, kx3, kw3, kb3 = jax.random.split(key, 7)

    # --- small shape consistent with the transformer module (D=32 -> padded to 128 lanes) ---
    B, S, D = 2, 8, 32
    x = jax.random.normal(kx, (B, S, D), dtype=jnp.float32)

    # deterministic "Linear(dim, dim)" params; stored pre-transposed (in, out)
    w = jax.random.normal(kw, (D, D), dtype=jnp.float32) * (1.0 / jnp.sqrt(D))
    b = jax.random.normal(kb, (D,), dtype=jnp.float32) * 0.02

    # nn.LayerNorm default init: weight=1, bias=0
    gamma = jnp.ones((D,), dtype=jnp.float32)
    beta = jnp.zeros((D,), dtype=jnp.float32)

    out = jax.block_until_ready(residual_forward(x, w, b, gamma, beta))
    ref = reference(x, w, b, gamma, beta)
    assert out.shape == (B, S, D)
    assert jnp.allclose(out, ref, atol=1e-4, rtol=1e-4), "mismatch vs reference"

    # --- multi-tile path with a partial (masked) edge block, no row padding ---
    B2, S2 = 4, 50  # 200 rows, tile_rows=64 -> 4 grid steps, last block partial
    x2 = jax.random.normal(kx2, (B2, S2, D), dtype=jnp.float32)
    out2 = jax.block_until_ready(residual_forward(x2, w, b, gamma, beta, tile_rows=64))
    ref2 = reference(x2, w, b, gamma, beta)
    assert out2.shape == (B2, S2, D)
    assert jnp.allclose(out2, ref2, atol=1e-4, rtol=1e-4), "mismatch (edge-block path)"

    # --- lane-dense D (no feature padding), auto tile size ---
    B3, S3, D3 = 2, 20, 128
    x3 = jax.random.normal(kx3, (B3, S3, D3), dtype=jnp.float32)
    w3 = jax.random.normal(kw3, (D3, D3), dtype=jnp.float32) * (1.0 / jnp.sqrt(D3))
    b3 = jax.random.normal(kb3, (D3,), dtype=jnp.float32) * 0.02
    gamma3 = jnp.ones((D3,), dtype=jnp.float32)
    beta3 = jnp.zeros((D3,), dtype=jnp.float32)
    out3 = jax.block_until_ready(residual_forward(x3, w3, b3, gamma3, beta3))
    ref3 = reference(x3, w3, b3, gamma3, beta3)
    assert out3.shape == (B3, S3, D3)
    assert jnp.allclose(out3, ref3, atol=1e-4, rtol=1e-4), "mismatch (lane-dense path)"

    print("KERNEL_OK")
</pallas_src>

<mosaic_0001>
module attributes {stable_mosaic.version = 11 : i64} {
  func.func @residual_kernel(%arg0: i32, %arg1: memref<8x128xf32, #tpu.memory_space<vmem>>, %arg2: memref<128x128xf32, #tpu.memory_space<vmem>>, %arg3: memref<1x128xf32, #tpu.memory_space<vmem>>, %arg4: memref<1x128xf32, #tpu.memory_space<vmem>>, %arg5: memref<1x128xf32, #tpu.memory_space<vmem>>, %arg6: memref<8x128xf32, #tpu.memory_space<vmem>>) attributes {dimension_semantics = [#tpu.dimension_semantics<parallel>], iteration_bounds = array<i64: 2>, scalar_prefetch = 0 : i64, scratch_operands = 0 : i64, tpu.core_type = #tpu.core_type<tc>, window_params = [{transform_indices = @transform_0, window_bounds = array<i64: 8, 128>}, {pipeline_mode = #tpu.pipeline_mode<synchronous>, transform_indices = @transform_1, window_bounds = array<i64: 128, 128>}, {pipeline_mode = #tpu.pipeline_mode<synchronous>, transform_indices = @transform_2, window_bounds = array<i64: 1, 128>}, {pipeline_mode = #tpu.pipeline_mode<synchronous>, transform_indices = @transform_3, window_bounds = array<i64: 1, 128>}, {pipeline_mode = #tpu.pipeline_mode<synchronous>, transform_indices = @transform_4, window_bounds = array<i64: 1, 128>}, {transform_indices = @transform_5, window_bounds = array<i64: 8, 128>}]} {
    %c0 = arith.constant 0 : index
    %c0_0 = arith.constant 0 : index
    %0 = vector.load %arg1[%c0, %c0_0] : memref<8x128xf32, #tpu.memory_space<vmem>>, vector<8x128xf32>
    %c0_1 = arith.constant 0 : index
    %c0_2 = arith.constant 0 : index
    %1 = vector.load %arg2[%c0_1, %c0_2] : memref<128x128xf32, #tpu.memory_space<vmem>>, vector<128x128xf32>
    %cst = arith.constant dense<0.000000e+00> : vector<8x128xf32>
    %2 = tpu.matmul %0, %1, %cst {dimension_numbers = #tpu.dot_dimension_numbers<[1], [0], [0], [1], [0, 0, 1, 1], [], []>} : vector<8x128xf32>, vector<128x128xf32>, vector<8x128xf32> -> vector<8x128xf32>
    %c0_3 = arith.constant 0 : index
    %c0_4 = arith.constant 0 : index
    %3 = vector.load %arg3[%c0_3, %c0_4] : memref<1x128xf32, #tpu.memory_space<vmem>>, vector<1x128xf32>
    %4 = vector.broadcast %3 : vector<1x128xf32> to vector<8x128xf32>
    %5 = arith.addf %2, %4 : vector<8x128xf32>
    %6 = arith.addf %0, %5 : vector<8x128xf32>
    %7 = tpu.iota {dimensions = array<i32: 1>} : vector<8x128xi32>
    %c32_i32 = arith.constant 32 : i32
    %8 = vector.broadcast %c32_i32 : i32 to vector<8x128xi32>
    %9 = arith.cmpi slt, %7, %8 : vector<8x128xi32>
    %cst_5 = arith.constant 0.000000e+00 : f32
    %10 = vector.broadcast %cst_5 : f32 to vector<8x128xf32>
    %11 = arith.select %9, %6, %10 : vector<8x128xi1>, vector<8x128xf32>
    %cst_6 = arith.constant dense<0.000000e+00> : vector<8xf32>
    %12 = vector.multi_reduction <add>, %11, %cst_6 [1] : vector<8x128xf32> to vector<8xf32>
    %13 = vector.shape_cast %12 : vector<8xf32> to vector<8x1xf32>
    %cst_7 = arith.constant 3.125000e-02 : f32
    %14 = vector.broadcast %cst_7 : f32 to vector<8x1xf32>
    %15 = arith.mulf %13, %14 : vector<8x1xf32>
    %16 = vector.broadcast %15 : vector<8x1xf32> to vector<8x128xf32>
    %17 = arith.subf %11, %16 : vector<8x128xf32>
    %cst_8 = arith.constant 0.000000e+00 : f32
    %18 = vector.broadcast %cst_8 : f32 to vector<8x128xf32>
    %19 = arith.select %9, %17, %18 : vector<8x128xi1>, vector<8x128xf32>
    %20 = arith.mulf %19, %19 : vector<8x128xf32>
    %cst_9 = arith.constant dense<0.000000e+00> : vector<8xf32>
    %21 = vector.multi_reduction <add>, %20, %cst_9 [1] : vector<8x128xf32> to vector<8xf32>
    %22 = vector.shape_cast %21 : vector<8xf32> to vector<8x1xf32>
    %cst_10 = arith.constant 3.125000e-02 : f32
    %23 = vector.broadcast %cst_10 : f32 to vector<8x1xf32>
    %24 = arith.mulf %22, %23 : vector<8x1xf32>
    %cst_11 = arith.constant 9.99999974E-6 : f32
    %25 = vector.broadcast %cst_11 : f32 to vector<8x1xf32>
    %26 = arith.addf %24, %25 : vector<8x1xf32>
    %27 = math.rsqrt %26 : vector<8x1xf32>
    %28 = vector.broadcast %27 : vector<8x1xf32> to vector<8x128xf32>
    %29 = arith.mulf %19, %28 : vector<8x128xf32>
    %c0_12 = arith.constant 0 : index
    %c0_13 = arith.constant 0 : index
    %30 = vector.load %arg4[%c0_12, %c0_13] : memref<1x128xf32, #tpu.memory_space<vmem>>, vector<1x128xf32>
    %31 = vector.broadcast %30 : vector<1x128xf32> to vector<8x128xf32>
    %32 = arith.mulf %29, %31 : vector<8x128xf32>
    %c0_14 = arith.constant 0 : index
    %c0_15 = arith.constant 0 : index
    %33 = vector.load %arg5[%c0_14, %c0_15] : memref<1x128xf32, #tpu.memory_space<vmem>>, vector<1x128xf32>
    %34 = vector.broadcast %33 : vector<1x128xf32> to vector<8x128xf32>
    %35 = arith.addf %32, %34 : vector<8x128xf32>
    %c0_16 = arith.constant 0 : index
    %c0_17 = arith.constant 0 : index
    %36 = vector.load %arg6[%c0_16, %c0_17] : memref<8x128xf32, #tpu.memory_space<vmem>>, vector<8x128xf32>
    tpu.vector_store %arg6[%c0_16, %c0_17], %35 {strides = array<i32>} : memref<8x128xf32, #tpu.memory_space<vmem>>, vector<8x128xf32>,
    return
  }
  func.func @transform_0(%arg0: i32) -> (i32, i32) {
    %c0_i32 = arith.constant 0 : i32
    %c0_i32_0 = arith.constant 0 : i32
    return %arg0, %c0_i32 : i32, i32
  }
  func.func @transform_1(%arg0: i32) -> (i32, i32) {
    %c0_i32 = arith.constant 0 : i32
    %c0_i32_0 = arith.constant 0 : i32
    %c0_i32_1 = arith.constant 0 : i32
    return %c0_i32, %c0_i32_0 : i32, i32
  }
  func.func @transform_2(%arg0: i32) -> (i32, i32) {
    %c0_i32 = arith.constant 0 : i32
    %c0_i32_0 = arith.constant 0 : i32
    %c0_i32_1 = arith.constant 0 : i32
    return %c0_i32, %c0_i32_0 : i32, i32
  }
  func.func @transform_3(%arg0: i32) -> (i32, i32) {
    %c0_i32 = arith.constant 0 : i32
    %c0_i32_0 = arith.constant 0 : i32
    %c0_i32_1 = arith.constant 0 : i32
    return %c0_i32, %c0_i32_0 : i32, i32
  }
  func.func @transform_4(%arg0: i32) -> (i32, i32) {
    %c0_i32 = arith.constant 0 : i32
    %c0_i32_0 = arith.constant 0 : i32
    %c0_i32_1 = arith.constant 0 : i32
    return %c0_i32, %c0_i32_0 : i32, i32
  }
  func.func @transform_5(%arg0: i32) -> (i32, i32) {
    %c0_i32 = arith.constant 0 : i32
    %c0_i32_0 = arith.constant 0 : i32
    return %arg0, %c0_i32 : i32, i32
  }
}

</mosaic_0001>

<bundles_post_ra>
// kernel: tpu_custom_call.1
= control target key start
LH: loop header
LB: loop body
LE: loop exit
PB: predicated region body
PF: predicated region fallthrough
CT: control target
= control target key end

     0   :  { %10 = vsyncpa [#allocation3], 0  ;;  %s1014_s0 = inlined_call_operand.hbm [shape: f32[16,128], index: 0, kind: input, shape index: {}]   ;;  %s1015_s1 = inlined_call_operand.hbm [shape: f32[128,128], index: 1, kind: input, shape index: {}]   ;;  %s1016_s2 = inlined_call_operand.vmem [shape: f32[1,128], index: 2, kind: input, shape index: {}]   ;;  %s1017_s3 = inlined_call_operand.vmem [shape: f32[1,128], index: 3, kind: input, shape index: {}]   ;;  %s1018_s4 = inlined_call_operand.vmem [shape: f32[1,128], index: 4, kind: input, shape index: {}]   ;;  %s1019_s5 = inlined_call_operand.hbm [shape: f32[16,128], index: 5, kind: output, shape index: {}]  }
   0x1   :  { %12 = vsyncpa [#allocation3 + $0x1], 0 }
   0x2   :  { %13 = vsyncpa [#allocation6], 0 }
   0x3   :  { %14 = vsyncpa [#allocation4], 0 }
   0x4   :  { %16 = vsyncpa [#allocation4 + $0x1], 0  ;;  %s802_s18 = smov 0   ;;  %s804_s19 = smov 0  }
   0x5   :  { %s806_s20 = smov 0   ;;  %s808_s21 = smov 0  }
   0x6 LB: > { %s823_s22 = sadd.s32 4294967295, %s762_s21   ;;  %s477_s23 = sadd.s32 4294967294, %s762_s21   ;;  %s762_s21 = sphi %s808_s21, %s1039_s21   ;;  %s758_s20 = sphi %s806_s20, %s1038_s20   ;;  %s754_s19 = sphi %s804_s19, %s1037_s19   ;;  %s750_s18 = sphi %s802_s18, %s1036_s18  }
   0x7   : > { %p42_p0 = scmp.ne.s32.totalorder %s754_s19, %s750_s18  ;;  %p1020_p1 = scmp.eq.s32.totalorder %s823_s22, 0 }
   0x8   : > { %p156_p3 = scmp.eq.s32.totalorder %s477_s23, 1  ;;  %p478_p5 = scmp.ge.s32.totalorder %s762_s21, 1 }
   0x9   : > { %p832_p4 = por %p1020_p1, %p42_p0  ;;  %p163_p7 = scmp.lt.s32.totalorder %s762_s21, 3 }
   0xa   : > { %p837_p6 = por %p156_p3, %p42_p0  ;;  %s764_s27 = smov [#allocation5]  }
   0xb   : > { %s1023_s24 = scalar_select %p832_p4, 1, 0 }
   0xc   : > { %s1024_s25 = scalar_select %p837_p6, 1, 0 }
   0xd   : > { %p842_p8 = pnand %p478_p5, %p163_p7  ;;  %s175_s28 = sshll.u32 %s764_s27, 4  ;;  %s846_s28 = int_to_ptr.vmem [resolvable:$true] %s175_s28 }
   0xe   : > { %s858_s30 = sadd.s32 1, %s762_s21   ;;  %s29_s6 = sadd.s32 1, %s758_s20 }
   0xf   : > { %s1025_s26 = scalar_select %p842_p8, 1, 0 }
  0x10   : > { %p578_p9 = pneg %p842_p8  ;;  %s26_s7 = ssub.s32 %s762_s21, %s858_s30 }
  0x11   : > { %s634_s10 = scalar_lea.hbm %s1015_s1, 2048 }
  0x12   : > { %p853_p11 = pnand %p578_p9, %p1020_p1  ;;  %p635_p12 = scmp.ne.s32.totalorder %s1015_s1, %s634_s10 }
  0x13   : > { %p641_p5 = scmp.lt.u32.totalorder %s634_s10, %s1015_s1 }
  0x14   : > { %p636_p13 = pneg %p853_p11 }
  0x16   : > { %p637_p0 = pnand %p636_p13, %p635_p12 }
  0x18   : > { %p638_p3 = pneg %p637_p0 }
  0x1a   : > { %p643_p7 = pnand %p641_p5, %p638_p3 }
  0x1c   : > { %646 = shalt.err (!%p643_p7)
}
  0x1d   : > { %s647_s15 = scalar_lea.vmem %s846_s28, 2048  ;;  %p655_p2 = scmp.lt.s32.totalorder %s846_s28, %s846_s28 }
  0x1e   : > { %p648_p9 = scmp.ne.s32.totalorder %s846_s28, %s647_s15  ;;  %p656_p6 = scmp.lt.s32.totalorder %s647_s15, %s647_s15 }
  0x20   : > { %p650_p10 = pnand %p648_p9, %p636_p13  ;;  %p657_p4 = por %p656_p6, %p655_p2 }
  0x22   : > { %p651_p1 = pneg %p650_p10 }
  0x24   : > { %p658_p8 = pnand %p657_p4, %p651_p1 }
  0x26   : > { %661 = shalt.err (!%p658_p8)
}
  0x27   : > { %s765_s16 = smov 128   ;;  %s766_s17 = smov 8  }
  0x28   : > { %581 = dma.hbm_to_vmem [thread:$0]  (!%p853_p11), %s1015_s1, 2048, %s846_s28, [#allocation6], %s765_s16, %s765_s16, %s766_s17  }
  0x29   : > { %p27_p2 = scmp.eq.s32.totalorder %s26_s7, 0  ;;  %p36_p1 = scmp.ne.s32.totalorder %s758_s20, %s754_s19 }
  0x2a   : > { %p37_p4 = scmp.eq.s32.totalorder %s762_s21, 0  ;;  %p591_p6 = scmp.lt.s32.totalorder %s762_s21, 2 }
  0x2b   : > { %s889_s8 = scalar_select %p27_p2, %s758_s20, %s29_s6  }
  0x2c   : > { %p38_p8 = por %p37_p4, %p36_p1  ;;  %p1027_p10 = scmp.eq.s32.totalorder %s823_s22, 1 }
  0x2d   : > { %s198_s10 = sand.u32 1, %s758_s20   ;;  %s482_s11 = sshll.u32 %s762_s21, 7 }
  0x2e   : > { %p893_p12 = por %p1027_p10, %p36_p1  ;;  %s481_s12 = sshll.u32 %s198_s10, 3 }
  0x2f   : > { %s902_s14 = scalar_lea.hbm %s1014_s0, %s482_s11  ;;  %s202_s28 = scalar_lea.vmem [#allocation2], %s481_s12 }
  0x30   : > { %s209_s6 = sshll.u32 %s202_s28, 4  ;;  %p904_p11 = pnand %p591_p6, %p38_p8  ;;  %s908_s6 = int_to_ptr.vmem [resolvable:$true] %s209_s6 }
  0x31   : > { %s199_s15 = scalar_lea.sflag [#allocation3], %s198_s10  ;;  %s662_s16 = scalar_lea.hbm %s902_s14, 128 }
  0x32   : > { %p663_p13 = scmp.ne.s32.totalorder %s902_s14, %s662_s16  ;;  %p664_p0 = pneg %p904_p11 }
  0x33   : > { %s667_s27 = scalar_lea.hbm %s1014_s0, 256  ;;  %p668_p7 = scmp.lt.u32.totalorder %s902_s14, %s1014_s0 }
  0x34   : > { %p665_p3 = pnand %p664_p0, %p663_p13  ;;  %p669_p9 = scmp.lt.u32.totalorder %s667_s27, %s662_s16 }
  0x35   : > { %p671_p1 = scmp.lt.u32.totalorder %s662_s16, %s902_s14 }
  0x36   : > { %p666_p5 = pneg %p665_p3  ;;  %p670_p2 = por %p669_p9, %p668_p7 }
  0x38   : > { %p672_p4 = por %p671_p1, %p670_p2 }
  0x3a   : > { %p673_p6 = pnand %p672_p4, %p666_p5 }
  0x3c   : > { %676 = shalt.err (!%p673_p6)
}
  0x3d   : > { %s677_s10 = scalar_lea.vmem %s908_s6, 128  ;;  %s767_s29 = smov [#allocation2]  }
  0x3e   : > { %p678_p8 = scmp.ne.s32.totalorder %s908_s6, %s677_s10  ;;  %s682_s13 = sshll.u32 %s767_s29, 4  ;;  %s683_s13 = int_to_ptr.vmem [resolvable:$false] %s682_s13 }
  0x3f   : > { %s684_s28 = scalar_lea.vmem %s683_s13, 256  ;;  %p685_p3 = scmp.lt.s32.totalorder %s908_s6, %s683_s13 }
  0x40   : > { %p680_p10 = pnand %p678_p8, %p664_p0  ;;  %p686_p7 = scmp.lt.s32.totalorder %s684_s28, %s677_s10 }
  0x42   : > { %p681_p13 = pneg %p680_p10  ;;  %p687_p9 = por %p686_p7, %p685_p3 }
  0x44   : > { %p688_p2 = pnand %p687_p9, %p681_p13 }
  0x46   : > { %691 = shalt.err (!%p688_p2)
}
  0x47   : > { %585 = dma.hbm_to_vmem [thread:$0]  (!%p904_p11), %s902_s14, 128, %s908_s6, %s199_s15  }
  0x48   : > { %p1030_p5 = scmp.ne.s32.totalorder %s1025_s26, 0 }
  0x49   : > { %s938_s16 = sand.u32 (!%p1030_p5), 1, %s754_s19   ;;  %p1031_p0 = scmp.ne.s32.totalorder (!%p1030_p5), %s1023_s24, 0 }
  0x4a   : > { %218 = sbr.rel (%p1030_p5) target bundleno = 662 (0x296), region = 40  ;;  %s484_s17 = sshll.u32 (!%p1030_p5), %s938_s16, 3 }
  0x4b   : > { %s221_s23 = scalar_lea.sflag (!%p1030_p5), [#allocation3], %s938_s16  ;;  %s944_s27 = scalar_lea.vmem (!%p1030_p5), [#allocation2], %s484_s17 }
  0x51   : > { %737 = dma.done.wait (%p1031_p0), %s221_s23, 128  }
  0x52   : > { %739 = vsyncadd (%p1031_p0), %s221_s23, 4294967168  ;;  %p1032_p11 = scmp.eq.s32.totalorder %s823_s22, 0 }
  0x54   : > { %741 = dma.done.wait (%p1032_p11), [#allocation6], 2048   ;;  %p1033_p1 = pmov %p1032_p11 }
  0x55   : > { %v768_v0 = vmov 0.0|0.0   ;;  %vm769_vm0 = vmmov 0   ;;  %v770_v1 = vmov 0.0   ;;  %v256_v2 = vld [vmem:[#allocation5] sm:$0xff]  ;;  %v257_v3 = vld [vmem:[#allocation5 + $0x8] sm:$0xff]  ;;  %v258_v4 = vld [vmem:[#allocation5 + $0x10] sm:$0xff]  ;;  %v350_v27 = vlaneseq }
  0x56   : > { %743 = vsyncadd (%p1033_p1), [#allocation6], 4294965248  ;;  %546 = vmatprep.subr.bf16.mxu0 %v768_v0  ;;  %543 = vmatprep.mubr.msk.f32.mxu0 %vm769_vm0, %v770_v1  ;;  %v547_v5 = vpack.c.bf16 %v257_v3, %v256_v2  ;;  %v259_v6 = vld [vmem:[#allocation5 + $0x18] sm:$0xff]  ;;  %v260_v8 = vld [vmem:[#allocation5 + $0x20] sm:$0xff]  ;;  %s491_s11 = sshll.u32 %s823_s22, 7  ;;  %s254_s12 = scalar_lea.vmem [#allocation7], %s484_s17 }
  0x57   : > { %v550_v7 = vpack.c.bf16 %v259_v6, %v258_v4  ;;  %v261_v9 = vld [vmem:[#allocation5 + $0x28] sm:$0xff]  ;;  %v262_v11 = vld [vmem:[#allocation5 + $0x30] sm:$0xff]  ;;  %v263_v12 = vld [vmem:[#allocation5 + $0x38] sm:$0xff]  ;;  %v351_v29 = vand.u32 127, %v350_v27  ;;  %s397_s10 = sshll.u32 %s254_s12, 4  ;;  %s970_s28 = scalar_lea.hbm %s1019_s5, %s491_s11  ;;  %s972_s10 = int_to_ptr.vmem [resolvable:$true] %s397_s10 }
  0x58   : > { %548 = vmatpush3.bf16.msra.mxu0 %v547_v5  ;;  %v553_v10 = vpack.c.bf16 %v261_v9, %v260_v8  ;;  %v556_v13 = vpack.c.bf16 %v263_v12, %v262_v11  ;;  %v264_v14 = vld [vmem:[#allocation5 + $0x40] sm:$0xff]  ;;  %v265_v15 = vld [vmem:[#allocation5 + $0x48] sm:$0xff]  ;;  %v266_v17 = vld [vmem:[#allocation5 + $0x50] sm:$0xff]  ;;  %s384_s23 = scalar_lea.sflag [#allocation4], %s938_s16  ;;  %s771_s22 = smov [#allocation7]  }
  0x59   : > { %549 = vmatprep.subr.bf16.mxu0 %v768_v0  ;;  %v559_v16 = vpack.c.bf16 %v265_v15, %v264_v14  ;;  %v267_v18 = vld [vmem:[#allocation5 + $0x58] sm:$0xff]  ;;  %v268_v20 = vld [vmem:[#allocation5 + $0x60] sm:$0xff]  ;;  %v269_v21 = vld [vmem:[#allocation5 + $0x68] sm:$0xff]  ;;  %vm352_vm1 = vcmp.lt.s32.totalorder %v351_v29, 32  ;;  %s696_s17 = sshll.u32 %s771_s22, 4  ;;  %s697_s17 = int_to_ptr.vmem [resolvable:$false] %s696_s17 }
  0x5a   : > { %v562_v19 = vpack.c.bf16 %v267_v18, %v266_v17  ;;  %v565_v22 = vpack.c.bf16 %v269_v21, %v268_v20  ;;  %v270_v23 = vld [vmem:[#allocation5 + $0x70] sm:$0xff]  ;;  %v271_v24 = vld [vmem:[#allocation5 + $0x78] sm:$0xff]  ;;  %s698_s24 = scalar_lea.vmem %s697_s17, 256  ;;  %p699_p10 = scmp.lt.s32.totalorder %s972_s10, %s697_s17 }
  0x5b   : > { %v568_v25 = vpack.c.bf16 %v271_v24, %v270_v23  ;;  %v255_v26 = vld [vmem:[%s944_s27] sm:$0xff]  ;;  %s692_s27 = scalar_lea.vmem %s972_s10, 128 }
  0x5c   : > { %551 = vmatpush3.bf16.msra.mxu0 %v550_v7  ;;  %v487_v28 = vld [vmem:[%s1016_s2] ss:$0 sm:$0xff]  ;;  %p693_p4 = scmp.ne.s32.totalorder %s972_s10, %s692_s27  ;;  %p700_p13 = scmp.lt.s32.totalorder %s698_s24, %s692_s27 }
  0x5d   : > { %552 = vmatprep.subr.bf16.mxu0 %v768_v0  ;;  %v488_v44 = vld [vmem:[%s1017_s3] ss:$0 sm:$0xff] }
  0x5e   : > { %v489_v46 = vld [vmem:[%s1018_s4] ss:$0 sm:$0xff]  ;;  %p694_p6 = pnand %p693_p4, %p893_p12  ;;  %p701_p3 = por %p700_p13, %p699_p10 }
  0x60   : > { %554 = vmatpush3.bf16.msra.mxu0 %v553_v10  ;;  %p695_p8 = pneg %p694_p6 }
  0x61   : > { %555 = vmatprep.subr.bf16.mxu0 %v768_v0 }
  0x62   : > { %p702_p7 = pnand %p701_p3, %p695_p8 }
  0x64   : > { %557 = vmatpush3.bf16.msra.mxu0 %v556_v13 }
  0x65   : > { %558 = vmatprep.subr.bf16.mxu0 %v768_v0 }
  0x68   : > { %560 = vmatpush3.bf16.msra.mxu0 %v559_v16 }
  0x69   : > { %561 = vmatprep.subr.bf16.mxu0 %v768_v0 }
  0x6c   : > { %563 = vmatpush3.bf16.msra.mxu0 %v562_v19 }
  0x6d   : > { %564 = vmatprep.subr.bf16.mxu0 %v768_v0 }
  0x70   : > { %566 = vmatpush3.bf16.msra.mxu0 %v565_v22 }
  0x71   : > { %567 = vmatprep.subr.bf16.mxu0 %v768_v0 }
  0x74   : > { %569 = vmatpush3.bf16.msra.mxu0 %v568_v25 }
  0x77   : > { %544 = vmatmul.mubr.f32.vlgmr.msra.gmra.mrb[0].mxu0 %v255_v26 }
 0x14a   : > { %v345_v30 = vpop.f32.mrb[0].mxu0 }
 0x14b   : > { %v346_v31 = vadd.f32 %v487_v28, %v345_v30  ;;  %v545_v32 = vpop.f32.mrb[1].mxu0 }
 0x14d   : > { %v349_v33 = vadd.f32 %v346_v31, %v255_v26 }
 0x14f   : > { %v353_v34 = vsel %vm352_vm1, %v349_v33, 0.0 }
 0x150   : > { %354 = vadd.xlane.f32.xlu0 %v353_v34 }
 0x1dd   : > { %v355_v35 = vpop.xlane.xlu0 %354 }
 0x1de   : > { %v356_v36 = vmul.f32 0.03125, %v355_v35 }
 0x1e0   : > { %v357_v37 = vsub.f32 %v353_v34, %v356_v36 }
 0x1e2   : > { %v358_v38 = vsel %vm352_vm1, %v357_v37, 0.0 }
 0x1e3   : > { %v359_v39 = vmul.f32 %v358_v38, %v358_v38 }
 0x1e5   : > { %360 = vadd.xlane.f32.xlu0 %v359_v39 }
 0x272   : > { %v361_v40 = vpop.xlane.xlu0 %360 }
 0x273   : > { %v362_v41 = vmul.f32 0.03125, %v361_v40 }
 0x275   : > { %v363_v42 = vadd.f32 1e-05, %v362_v41 }
 0x277   : > { %632 = vrsqrt.f32 %v363_v42 }
 0x281   : > { %v633_v43 = vpop.eup %632 }
 0x282   : > { %v365_v45 = vmul.f32 %v633_v43, %v358_v38 }
 0x284   : > { %v373_v47 = vmul.f32 %v488_v44, %v365_v45 }
 0x286   : > { %v381_v48 = vadd.f32 %v489_v46, %v373_v47 }
 0x288   : > { %382 = vst [vmem:[%s254_s12] sm:$0xff] %v381_v48 }
 0x289   : > { %705 = shalt.err (!%p702_p7)
}
 0x28a   : > { %s706_s16 = scalar_lea.hbm %s970_s28, 128  ;;  %s710_s6 = scalar_lea.hbm %s1019_s5, 256 }
 0x28b   : > { %p707_p9 = scmp.ne.s32.totalorder %s970_s28, %s706_s16  ;;  %p711_p0 = scmp.lt.u32.totalorder %s970_s28, %s1019_s5 }
 0x28c   : > { %p712_p11 = scmp.lt.u32.totalorder %s710_s6, %s706_s16  ;;  %p714_p4 = scmp.lt.u32.totalorder %s706_s16, %s970_s28 }
 0x28d   : > { %p708_p2 = pnand %p707_p9, %p893_p12 }
 0x28e   : > { %p713_p1 = por %p712_p11, %p711_p0 }
 0x28f   : > { %p709_p5 = pneg %p708_p2 }
 0x290   : > { %p715_p6 = por %p714_p4, %p713_p1 }
 0x292   : > { %p716_p8 = pnand %p715_p6, %p709_p5 }
 0x294   : > { %719 = shalt.err (!%p716_p8)
}
 0x295   : > { %576 = dma.vmem_to_hbm [thread:$0]  (%p893_p12), %s972_s10, 128, %s970_s28, %s384_s23  }
 0x296 PF: > { %s409_s11 = sand.u32 1, %s750_s18   ;;  %p1034_p10 = scmp.ne.s32.totalorder %s1024_s25, 0 }
 0x297   : > { %p1035_p13 = scmp.ge.s32.totalorder %s762_s21, 2  ;;  %s410_s12 = scalar_lea.sflag [#allocation4], %s409_s11 }
 0x299   : > { %p587_p3 = pnand %p1035_p13, %p1034_p10 }
 0x29b   : > { %745 = dma.done.wait (!%p587_p3), %s410_s12, 128  }
 0x29c   : > { %747 = vsyncadd (!%p587_p3), %s410_s12, 4294967168  ;;  %p19_p7 = scmp.ge.s32.totalorder %s858_s30, 4   ;;  %s1036_s18 = smov %s754_s19 }
 0x29d   : > { %s1037_s19 = smov %s758_s20  ;;  %s1038_s20 = smov %s889_s8 }
 0x29e   : > { %s1039_s21 = smov %s858_s30  ;;  %21 = sbr.rel (!%p19_p7) target bundleno = 6 (0x6), region = 89 }
 0x2a5   :  { %415 = vsyncpa [#allocation3], 1 }
 0x2a6   :  { %417 = vsyncpa [#allocation3 + $0x1], 1 }
 0x2a7   :  { %418 = vsyncpa [#allocation6], 1 }
 0x2a8   :  { %419 = vsyncpa [#allocation4], 1 }
 0x2a9   :  { %421 = vsyncpa [#allocation4 + $0x1], 1 }

</bundles_post_ra>
